<compile_context>
chip_gen: v7x
topology: tpu7x:2x2x1
jax: 0.10.0
libtpu: 0.0.40
codegen_flags: <defaults>
</compile_context>

<pallas_src>
import functools

import jax
import jax.numpy as jnp
from jax.experimental import pallas as pl
from jax.experimental.pallas import tpu as pltpu


def _dp_weighting_kernel(diff_ref, out_ref, *, tao, c1):
    diff = diff_ref[...].astype(jnp.float32)
    weights = 1.0 - c1 * (diff - tao)
    out_ref[...] = jnp.where(diff >= tao, weights, 1.0).astype(out_ref.dtype)


def _block_elems_target():
    """Per-generation target elements per block (f32) and scoped-VMEM limit."""
    try:
        kind = jax.devices()[0].device_kind.lower()
    except Exception:
        kind = ""
    # v5e: 16 MiB scoped-VMEM default -> keep ~2 MiB blocks, default limit.
    if "v5 lite" in kind or "v5e" in kind or "v5lite" in kind:
        return 512 * 1024, None
    # v6e / v7x: ~4 MiB blocks (2x in + 2x out buffers ~= 16 MiB) with an
    # explicit 32 MiB scoped-VMEM limit (headroom on v7x's 64 MiB physical).
    return 1024 * 1024, 32 * 1024 * 1024


def dp_weighting(loss, diff, *args, tao, alpha=0.5, out_dtype=jnp.float32):
    """Pallas TPU implementation of DPWeighting.forward.

    Args:
      loss: unused (kept for signature parity with the PyTorch module).
      diff: array of arbitrary shape (e.g. NCHW [B, C, H, W]).
      tao:  scalar threshold.
      alpha: scalar weighting factor.
      out_dtype: output dtype; defaults to float32 to match PyTorch's .float().
                 Pass diff.dtype to halve writeback bytes for bf16 inputs.

    Returns:
      `out_dtype` array with the same shape as `diff`.
    """
    del loss, args  # forward output depends only on `diff`

    orig_shape = diff.shape
    n = int(diff.size)
    out_dtype = jnp.dtype(out_dtype)

    if n == 0:  # degenerate: nothing to compute
        return jnp.zeros(orig_shape, dtype=out_dtype)

    # Fold alpha/(1 - tao) at trace time. Use IEEE semantics (inf/-inf/nan)
    # instead of a Python ZeroDivisionError when tao == 1.0.
    denom = 1.0 - float(tao)
    a = float(alpha)
    if denom != 0.0:
        c1 = a / denom
    else:
        c1 = float("inf") if a > 0 else (float("-inf") if a < 0 else float("nan"))

    flat = diff.reshape(-1)

    # Lane-dense packing: pick a LANE (multiple of 128) dividing n so no
    # pad/slice round trips are needed.
    LANE = None
    for cand in (1024, 512, 256, 128):
        if n % cand == 0:
            LANE = cand
            break

    pad = 0
    if LANE is None:
        if n <= 1024:
            # Tiny, non-128-divisible input: one full-array block, no pad.
            LANE = n
        else:
            # Rare path: pad only the small tail (< 1024 elements).
            LANE = 1024
            rows_needed = pl.cdiv(n, LANE)
            pad = rows_needed * LANE - n
            flat = jnp.pad(flat, (0, pad))

    rows = (n + pad) // LANE
    diff2d = flat.reshape(rows, LANE)

    elems_target, vmem_limit = _block_elems_target()
    tr_target = max(8, (elems_target // LANE) // 8 * 8)

    if rows <= tr_target:
        tr = rows           # single full-extent block (always legal)
        grid = 1
    else:
        tr = tr_target
        # Keep >= 4 pipeline steps: DMA/compute overlap everywhere and
        # 2-TensorCore sharding on v7x for mid-size inputs.
        while tr > 64 and pl.cdiv(rows, tr) < 4:
            tr //= 2
        grid = pl.cdiv(rows, tr)

    kernel = functools.partial(_dp_weighting_kernel, tao=float(tao), c1=c1)

    out2d = pl.pallas_call(
        kernel,
        out_shape=jax.ShapeDtypeStruct((rows, LANE), out_dtype),
        grid=(grid,),
        in_specs=[pl.BlockSpec((tr, LANE), lambda i: (i, 0))],
        out_specs=pl.BlockSpec((tr, LANE), lambda i: (i, 0)),
        compiler_params=pltpu.CompilerParams(
            dimension_semantics=("parallel",),
            vmem_limit_bytes=vmem_limit,
        ),
    )(diff2d)

    out_flat = out2d.reshape(-1)
    if pad:
        out_flat = out_flat[:n]
    return out_flat.reshape(orig_shape)


def _reference(diff, tao, alpha):
    weights = (1.0 - alpha * (diff - tao) / (1.0 - tao)).astype(jnp.float32)
    return jnp.where(diff >= tao, weights, jnp.ones_like(weights))


if __name__ == "__main__":
    key = jax.random.PRNGKey(0)
    k_loss, k_diff, k_a, k_b = jax.random.split(key, 4)

    tao = 0.7
    alpha = 0.5

    # Main test: NCHW-like, n divisible by 1024 -> zero-copy wrapper path.
    B, C, H, W = 2, 4, 16, 16
    loss = jax.random.uniform(k_loss, (B, C, H, W), dtype=jnp.float32)
    diff = jax.random.uniform(k_diff, (B, C, H, W), dtype=jnp.float32)

    confs = jax.block_until_ready(dp_weighting(loss, diff, tao=tao, alpha=alpha))
    assert confs.shape == diff.shape and confs.dtype == jnp.float32
    assert jnp.allclose(confs, _reference(diff, tao, alpha), atol=1e-6)

    # Tiny non-128-divisible input: single full-array block, no pad.
    d_small = jax.random.uniform(k_a, (3, 5, 7), dtype=jnp.float32)
    c_small = jax.block_until_ready(dp_weighting(None, d_small, tao=tao, alpha=alpha))
    assert jnp.allclose(c_small, _reference(d_small, tao, alpha), atol=1e-6)

    # Larger non-divisible input: minimal-tail pad path.
    d_odd = jax.random.uniform(k_b, (1, 1, 37, 37), dtype=jnp.float32)
    c_odd = jax.block_until_ready(dp_weighting(None, d_odd, tao=tao, alpha=alpha))
    assert jnp.allclose(c_odd, _reference(d_odd, tao, alpha), atol=1e-6)

    print("KERNEL_OK")
</pallas_src>

<mosaic_0001>
module attributes {stable_mosaic.version = 11 : i64} {
  func.func @_dp_weighting_kernel(%arg0: i32, %arg1: memref<2x1024xf32, #tpu.memory_space<vmem>>, %arg2: memref<2x1024xf32, #tpu.memory_space<vmem>>) attributes {dimension_semantics = [#tpu.dimension_semantics<parallel>], iteration_bounds = array<i64: 1>, scalar_prefetch = 0 : i64, scratch_operands = 0 : i64, tpu.core_type = #tpu.core_type<tc>, window_params = [{transform_indices = @transform_0, window_bounds = array<i64: 2, 1024>}, {transform_indices = @transform_1, window_bounds = array<i64: 2, 1024>}]} {
    %c0 = arith.constant 0 : index
    %c0_0 = arith.constant 0 : index
    %0 = vector.load %arg1[%c0, %c0_0] : memref<2x1024xf32, #tpu.memory_space<vmem>>, vector<2x1024xf32>
    %cst = arith.constant 0.699999988 : f32
    %1 = vector.broadcast %cst : f32 to vector<2x1024xf32>
    %2 = arith.subf %0, %1 : vector<2x1024xf32>
    %cst_1 = arith.constant 1.66666663 : f32
    %3 = vector.broadcast %cst_1 : f32 to vector<2x1024xf32>
    %4 = arith.mulf %3, %2 : vector<2x1024xf32>
    %cst_2 = arith.constant 1.000000e+00 : f32
    %5 = vector.broadcast %cst_2 : f32 to vector<2x1024xf32>
    %6 = arith.subf %5, %4 : vector<2x1024xf32>
    %cst_3 = arith.constant 0.699999988 : f32
    %7 = vector.broadcast %cst_3 : f32 to vector<2x1024xf32>
    %8 = arith.cmpf oge, %0, %7 : vector<2x1024xf32>
    %cst_4 = arith.constant 1.000000e+00 : f32
    %9 = vector.broadcast %cst_4 : f32 to vector<2x1024xf32>
    %10 = arith.select %8, %6, %9 : vector<2x1024xi1>, vector<2x1024xf32>
    %c0_5 = arith.constant 0 : index
    %c0_6 = arith.constant 0 : index
    %11 = vector.load %arg2[%c0_5, %c0_6] : memref<2x1024xf32, #tpu.memory_space<vmem>>, vector<2x1024xf32>
    tpu.vector_store %arg2[%c0_5, %c0_6], %10 {strides = array<i32>} : memref<2x1024xf32, #tpu.memory_space<vmem>>, vector<2x1024xf32>,
    return
  }
  func.func @transform_0(%arg0: i32) -> (i32, i32) {
    %c0_i32 = arith.constant 0 : i32
    %c0_i32_0 = arith.constant 0 : i32
    return %arg0, %c0_i32 : i32, i32
  }
  func.func @transform_1(%arg0: i32) -> (i32, i32) {
    %c0_i32 = arith.constant 0 : i32
    %c0_i32_0 = arith.constant 0 : i32
    return %arg0, %c0_i32 : i32, i32
  }
}

</mosaic_0001>

<bundles_post_ra>
// kernel: tpu_custom_call.1
= control target key start
LH: loop header
LB: loop body
LE: loop exit
PB: predicated region body
PF: predicated region fallthrough
CT: control target
= control target key end

     0   :  { %6 = vsyncpa [#allocation3], 0  ;;  %s138_s0 = inlined_call_operand.hbm [shape: f32[2,1024], index: 0, kind: input, shape index: {}]   ;;  %s139_s1 = inlined_call_operand.hbm [shape: f32[2,1024], index: 1, kind: output, shape index: {}]  }
   0x1   :  { %7 = vsyncpa [#allocation4], 0  ;;  %s102_s6 = smov [#allocation2]   ;;  %s54_s10 = scalar_lea.hbm %s138_s0, 256 }
   0x2   :  { %s14_s7 = sshll.u32 %s102_s6, 4  ;;  %p55_p0 = scmp.ne.s32.totalorder %s138_s0, %s54_s10  ;;  %s15_s7 = int_to_ptr.vmem [resolvable:$true] %s14_s7 }
   0x3   :  { %p58_p1 = scmp.lt.u32.totalorder %s54_s10, %s138_s0 }
   0x5   :  { %p60_p2 = pnand %p58_p1, %p55_p0 }
   0x7   :  { %63 = shalt.err (!%p60_p2)
}
   0x8   :  { %s64_s15 = scalar_lea.vmem %s15_s7, 256  ;;  %p69_p4 = scmp.lt.s32.totalorder %s15_s7, %s15_s7 }
   0x9   :  { %p65_p3 = scmp.ne.s32.totalorder %s15_s7, %s64_s15  ;;  %p70_p5 = scmp.lt.s32.totalorder %s64_s15, %s64_s15 }
   0xb   :  { %p71_p6 = por %p70_p5, %p69_p4 }
   0xd   :  { %p72_p7 = pnand %p71_p6, %p65_p3 }
   0xf   :  { %75 = shalt.err (!%p72_p7)
}
  0x10   :  { %17 = dma.hbm_to_vmem [thread:$0]  %s138_s0, 256, %s15_s7, [#allocation3]  }
  0x11   :  { %98 = dma.done.wait [#allocation3], 256  }
  0x12   :  { %99 = vsyncadd [#allocation3], 4294967040  ;;  %v21_v0 = vld [vmem:[#allocation2] sm:$0xff]  ;;  %v22_v1 = vld [vmem:[#allocation2 + $0x8] sm:$0xff]  ;;  %s103_s18 = smov [#allocation5]  }
  0x13   :  { %v50_v2 = vadd.f32 -0.7, %v21_v0  ;;  %v51_v3 = vadd.f32 -0.7, %v22_v1  ;;  %s41_s19 = sshll.u32 %s103_s18, 4  ;;  %s42_s19 = int_to_ptr.vmem [resolvable:$true] %s41_s19 }
  0x14   :  { %vm29_vm0 = vcmp.ge.f32.partialorder %v21_v0, 0.7  ;;  %vm30_vm1 = vcmp.ge.f32.partialorder %v22_v1, 0.7  ;;  %s76_s0 = scalar_lea.vmem %s42_s19, 256  ;;  %p81_p9 = scmp.lt.s32.totalorder %s42_s19, %s42_s19 }
  0x15   :  { %v25_v4 = vmul.f32 1.6666666, %v50_v2  ;;  %v26_v5 = vmul.f32 1.6666666, %v51_v3  ;;  %p77_p8 = scmp.ne.s32.totalorder %s42_s19, %s76_s0  ;;  %p82_p10 = scmp.lt.s32.totalorder %s76_s0, %s76_s0 }
  0x17   :  { %v27_v6 = vsub.f32 1.0, %v25_v4  ;;  %v28_v7 = vsub.f32 1.0, %v26_v5  ;;  %p83_p11 = por %p82_p10, %p81_p9 }
  0x19   :  { %v31_v8 = vsel %vm29_vm0, %v27_v6, 1.0  ;;  %v32_v9 = vsel %vm30_vm1, %v28_v7, 1.0  ;;  %p84_p12 = pnand %p83_p11, %p77_p8 }
  0x1a   :  { %33 = vst [vmem:[#allocation5] sm:$0xff] %v31_v8  ;;  %34 = vst [vmem:[#allocation5 + $0x8] sm:$0xff] %v32_v9 }
  0x1b   :  { %87 = shalt.err (!%p84_p12)
}
  0x1c   :  { %s88_s22 = scalar_lea.hbm %s139_s1, 256 }
  0x1d   :  { %p89_p13 = scmp.ne.s32.totalorder %s139_s1, %s88_s22  ;;  %p92_p0 = scmp.lt.u32.totalorder %s88_s22, %s139_s1 }
  0x1f   :  { %p94_p1 = pnand %p92_p0, %p89_p13 }
  0x21   :  { %97 = shalt.err (!%p94_p1)
}
  0x22   :  { %44 = dma.vmem_to_hbm [thread:$0]  %s42_s19, 256, %s139_s1, [#allocation4]  }
  0x23   :  { %100 = dma.done.wait [#allocation4], 256  }
  0x24   :  { %101 = vsyncadd [#allocation4], 4294967040 }
  0x25   :  { %48 = vsyncpa [#allocation3], 1 }
  0x26   :  { %49 = vsyncpa [#allocation4], 1 }

</bundles_post_ra>
